<compile_context>
chip_gen: v5e
topology: v5e:2x2
jax: 0.10.0
libtpu: 0.0.40
codegen_flags: <defaults>
</compile_context>

<pallas_src>
import jax
import jax.numpy as jnp
import numpy as np
from jax.experimental import pallas as pl
from jax.experimental.pallas import tpu as pltpu


# ---------------------------------------------------------------------------
# Padding helpers
# ---------------------------------------------------------------------------
_DEFAULT_LANE = 128  # use 256 on v6e/v7x for realistic dims (2x256x256 MXU)


def _round_up(n, m):
    return ((n + m - 1) // m) * m


def _pad2d(a, rows, cols, dtype):
    out = jnp.zeros((rows, cols), dtype)
    return out.at[: a.shape[0], : a.shape[1]].set(a.astype(dtype))


# ---------------------------------------------------------------------------
# Fused kernel: Linear+ReLU -> masked Linear -> masked Linear
# Weights are pre-masked, pre-transposed to (Din, Dout), zero-padded on the
# output dims; biases are (1, Dout_p).  MXU operands take the weight dtype,
# accumulation and elementwise math stay f32.
# ---------------------------------------------------------------------------
def _fused_masked_model_kernel(
    x_ref,            # (bt, D_in)
    w1_ref, b1_ref,   # (D_in, H1_p), (1, H1_p)
    w2_ref, b2_ref,   # (H1_p, H2_p), (1, H2_p)   -- already W*sigmoid(M), transposed
    w3_ref, b3_ref,   # (H2_p, Dout_p), (1, Dout_p)
    o_ref,            # (bt, Dout_p)
):
    cdt = w1_ref.dtype  # MXU operand dtype (f32 or bf16); no-op cast when f32

    # Layer 0: plain Linear + ReLU (unmasked -- not in the trailing dense run).
    h = jnp.dot(x_ref[...].astype(cdt), w1_ref[...],
                preferred_element_type=jnp.float32)
    h = jnp.maximum(h + b1_ref[...], 0.0)

    # Layer 1: masked Linear (mask already folded into the weight).
    h = jnp.dot(h.astype(cdt), w2_ref[...],
                preferred_element_type=jnp.float32) + b2_ref[...]

    # Layer 2: masked Linear.
    y = jnp.dot(h.astype(cdt), w3_ref[...],
                preferred_element_type=jnp.float32) + b3_ref[...]

    o_ref[...] = y.astype(o_ref.dtype)


# ---------------------------------------------------------------------------
# Parameter preparation (done once, or whenever the masks change):
#   fold sigmoid(mask) into the weights, transpose to (Din, Dout), zero-pad
#   the output dims to lane multiples.  Biases stored as (1, Dout_p).
# ---------------------------------------------------------------------------
def prepare_params(params, *, lane=_DEFAULT_LANE, weight_dtype=jnp.float32):
    d_in, h1 = params["w1"].shape[1], params["w1"].shape[0]
    h2, d_out = params["w2"].shape[0], params["w3"].shape[0]

    h1_p = _round_up(h1, lane)
    h2_p = _round_up(h2, lane)
    d_out_p = _round_up(d_out, lane)

    w2m = params["w2"] * jax.nn.sigmoid(params["m2"])   # (H2, H1)
    w3m = params["w3"] * jax.nn.sigmoid(params["m3"])   # (D_out, H2)

    prepped = {
        # K of layer 0 is left at d_in (x is passed unpadded).
        "w1t": _pad2d(params["w1"].T, d_in, h1_p, weight_dtype),
        "b1":  _pad2d(params["b1"].reshape(1, -1), 1, h1_p, jnp.float32),
        "w2m": _pad2d(w2m.T, h1_p, h2_p, weight_dtype),
        "b2":  _pad2d(params["b2"].reshape(1, -1), 1, h2_p, jnp.float32),
        "w3m": _pad2d(w3m.T, h2_p, d_out_p, weight_dtype),
        "b3":  _pad2d(params["b3"].reshape(1, -1), 1, d_out_p, jnp.float32),
    }
    return prepped


# ---------------------------------------------------------------------------
# Forward pass: one pallas_call, batch-tiled grid, weights resident per tile.
# ---------------------------------------------------------------------------
def masked_model_forward(x, prepped, d_out, bt=256):
    B, d_in = x.shape
    h1_p = prepped["w1t"].shape[1]
    h2_p = prepped["w2m"].shape[1]
    d_out_p = prepped["w3m"].shape[1]

    if B <= bt:
        # Single tile: no batch padding, no extra HBM round-trip for x.
        bt_eff, b_p = B, B
    else:
        bt_eff = bt
        b_p = _round_up(B, bt)
        if b_p != B:
            x = jnp.zeros((b_p, d_in), x.dtype).at[:B, :].set(x)

    grid = (b_p // bt_eff,)

    grid_spec = pltpu.PrefetchScalarGridSpec(
        num_scalar_prefetch=0,
        grid=grid,
        in_specs=[
            pl.BlockSpec((bt_eff, d_in), lambda i: (i, 0)),
            pl.BlockSpec((d_in, h1_p), lambda i: (0, 0)),
            pl.BlockSpec((1, h1_p), lambda i: (0, 0)),
            pl.BlockSpec((h1_p, h2_p), lambda i: (0, 0)),
            pl.BlockSpec((1, h2_p), lambda i: (0, 0)),
            pl.BlockSpec((h2_p, d_out_p), lambda i: (0, 0)),
            pl.BlockSpec((1, d_out_p), lambda i: (0, 0)),
        ],
        out_specs=pl.BlockSpec((bt_eff, d_out_p), lambda i: (i, 0)),
    )

    out_p = pl.pallas_call(
        _fused_masked_model_kernel,
        out_shape=jax.ShapeDtypeStruct((b_p, d_out_p), jnp.float32),
        grid_spec=grid_spec,
        compiler_params=pltpu.CompilerParams(
            dimension_semantics=("parallel",),
        ),
    )(
        x,
        prepped["w1t"], prepped["b1"],
        prepped["w2m"], prepped["b2"],
        prepped["w3m"], prepped["b3"],
    )
    return out_p[:B, :d_out]


masked_model_forward = jax.jit(masked_model_forward, static_argnames=("d_out", "bt"))


# ---------------------------------------------------------------------------
# Pure-JAX reference (mirrors the PyTorch hook semantics exactly).
# ---------------------------------------------------------------------------
def masked_model_reference(x, params):
    h = jnp.maximum(x @ params["w1"].T + params["b1"], 0.0)
    h = h @ (params["w2"] * jax.nn.sigmoid(params["m2"])).T + params["b2"]
    y = h @ (params["w3"] * jax.nn.sigmoid(params["m3"])).T + params["b3"]
    return y


# ---------------------------------------------------------------------------
# Main
# ---------------------------------------------------------------------------
if __name__ == "__main__":
    B, D_IN, H1, H2, D_OUT = 2, 32, 64, 64, 32

    key = jax.random.PRNGKey(0)
    k_x, k_xb, k_w1, k_b1, k_w2, k_b2, k_w3, k_b3 = jax.random.split(key, 8)

    params = {
        "w1": jax.random.normal(k_w1, (H1, D_IN), jnp.float32) * 0.1,
        "b1": jax.random.normal(k_b1, (H1,), jnp.float32) * 0.1,
        "w2": jax.random.normal(k_w2, (H2, H1), jnp.float32) * 0.1,
        "b2": jax.random.normal(k_b2, (H2,), jnp.float32) * 0.1,
        "w3": jax.random.normal(k_w3, (D_OUT, H2), jnp.float32) * 0.1,
        "b3": jax.random.normal(k_b3, (D_OUT,), jnp.float32) * 0.1,
        # masks initialized to ones, exactly like torch.ones_like(module.weight)
        "m2": jnp.ones((H2, H1), jnp.float32),
        "m3": jnp.ones((D_OUT, H2), jnp.float32),
    }

    # weight_dtype=jnp.bfloat16 halves weight DMA / doubles MXU throughput on
    # v6e/v7x (and feeds the v5e MXU natively); kept f32 here for a 1e-5 check.
    prepped = prepare_params(params, weight_dtype=jnp.float32)

    # --- small batch: single-tile path, no padding of x at all -------------
    x = jax.random.normal(k_x, (B, D_IN), jnp.float32)
    out = masked_model_forward(x, prepped, d_out=D_OUT)
    out = jax.block_until_ready(out)
    ref = masked_model_reference(x, params)
    np.testing.assert_allclose(np.asarray(out), np.asarray(ref), rtol=1e-5, atol=1e-5)

    # --- larger batch: batch-tiled grid path (2 tiles of 256 rows) ----------
    x_big = jax.random.normal(k_xb, (512, D_IN), jnp.float32)
    out_big = masked_model_forward(x_big, prepped, d_out=D_OUT)
    out_big = jax.block_until_ready(out_big)
    ref_big = masked_model_reference(x_big, params)
    np.testing.assert_allclose(np.asarray(out_big), np.asarray(ref_big),
                               rtol=1e-5, atol=1e-5)

    print("KERNEL_OK")
</pallas_src>

<mosaic_0001>
module attributes {stable_mosaic.version = 11 : i64} {
  func.func @_fused_masked_model_kernel(%arg0: i32, %arg1: memref<2x32xf32, #tpu.memory_space<vmem>>, %arg2: memref<32x128xf32, #tpu.memory_space<vmem>>, %arg3: memref<1x128xf32, #tpu.memory_space<vmem>>, %arg4: memref<128x128xf32, #tpu.memory_space<vmem>>, %arg5: memref<1x128xf32, #tpu.memory_space<vmem>>, %arg6: memref<128x128xf32, #tpu.memory_space<vmem>>, %arg7: memref<1x128xf32, #tpu.memory_space<vmem>>, %arg8: memref<2x128xf32, #tpu.memory_space<vmem>>) attributes {dimension_semantics = [#tpu.dimension_semantics<parallel>], iteration_bounds = array<i64: 1>, scalar_prefetch = 0 : i64, scratch_operands = 0 : i64, tpu.core_type = #tpu.core_type<tc>, window_params = [{transform_indices = @transform_0, window_bounds = array<i64: 2, 32>}, {pipeline_mode = #tpu.pipeline_mode<synchronous>, transform_indices = @transform_1, window_bounds = array<i64: 32, 128>}, {pipeline_mode = #tpu.pipeline_mode<synchronous>, transform_indices = @transform_2, window_bounds = array<i64: 1, 128>}, {pipeline_mode = #tpu.pipeline_mode<synchronous>, transform_indices = @transform_3, window_bounds = array<i64: 128, 128>}, {pipeline_mode = #tpu.pipeline_mode<synchronous>, transform_indices = @transform_4, window_bounds = array<i64: 1, 128>}, {pipeline_mode = #tpu.pipeline_mode<synchronous>, transform_indices = @transform_5, window_bounds = array<i64: 128, 128>}, {pipeline_mode = #tpu.pipeline_mode<synchronous>, transform_indices = @transform_6, window_bounds = array<i64: 1, 128>}, {transform_indices = @transform_7, window_bounds = array<i64: 2, 128>}]} {
    %c0 = arith.constant 0 : index
    %c0_0 = arith.constant 0 : index
    %0 = vector.load %arg1[%c0, %c0_0] : memref<2x32xf32, #tpu.memory_space<vmem>>, vector<2x32xf32>
    %c0_1 = arith.constant 0 : index
    %c0_2 = arith.constant 0 : index
    %1 = vector.load %arg2[%c0_1, %c0_2] : memref<32x128xf32, #tpu.memory_space<vmem>>, vector<32x128xf32>
    %cst = arith.constant dense<0.000000e+00> : vector<2x128xf32>
    %2 = tpu.matmul %0, %1, %cst {dimension_numbers = #tpu.dot_dimension_numbers<[1], [0], [0], [1], [0, 0, 1, 1], [], []>} : vector<2x32xf32>, vector<32x128xf32>, vector<2x128xf32> -> vector<2x128xf32>
    %c0_3 = arith.constant 0 : index
    %c0_4 = arith.constant 0 : index
    %3 = vector.load %arg3[%c0_3, %c0_4] : memref<1x128xf32, #tpu.memory_space<vmem>>, vector<1x128xf32>
    %4 = vector.broadcast %3 : vector<1x128xf32> to vector<2x128xf32>
    %5 = arith.addf %2, %4 : vector<2x128xf32>
    %cst_5 = arith.constant 0.000000e+00 : f32
    %6 = vector.broadcast %cst_5 : f32 to vector<2x128xf32>
    %7 = arith.maximumf %5, %6 : vector<2x128xf32>
    %c0_6 = arith.constant 0 : index
    %c0_7 = arith.constant 0 : index
    %8 = vector.load %arg4[%c0_6, %c0_7] : memref<128x128xf32, #tpu.memory_space<vmem>>, vector<128x128xf32>
    %cst_8 = arith.constant dense<0.000000e+00> : vector<2x128xf32>
    %9 = tpu.matmul %7, %8, %cst_8 {dimension_numbers = #tpu.dot_dimension_numbers<[1], [0], [0], [1], [0, 0, 1, 1], [], []>} : vector<2x128xf32>, vector<128x128xf32>, vector<2x128xf32> -> vector<2x128xf32>
    %c0_9 = arith.constant 0 : index
    %c0_10 = arith.constant 0 : index
    %10 = vector.load %arg5[%c0_9, %c0_10] : memref<1x128xf32, #tpu.memory_space<vmem>>, vector<1x128xf32>
    %11 = vector.broadcast %10 : vector<1x128xf32> to vector<2x128xf32>
    %12 = arith.addf %9, %11 : vector<2x128xf32>
    %c0_11 = arith.constant 0 : index
    %c0_12 = arith.constant 0 : index
    %13 = vector.load %arg6[%c0_11, %c0_12] : memref<128x128xf32, #tpu.memory_space<vmem>>, vector<128x128xf32>
    %cst_13 = arith.constant dense<0.000000e+00> : vector<2x128xf32>
    %14 = tpu.matmul %12, %13, %cst_13 {dimension_numbers = #tpu.dot_dimension_numbers<[1], [0], [0], [1], [0, 0, 1, 1], [], []>} : vector<2x128xf32>, vector<128x128xf32>, vector<2x128xf32> -> vector<2x128xf32>
    %c0_14 = arith.constant 0 : index
    %c0_15 = arith.constant 0 : index
    %15 = vector.load %arg7[%c0_14, %c0_15] : memref<1x128xf32, #tpu.memory_space<vmem>>, vector<1x128xf32>
    %16 = vector.broadcast %15 : vector<1x128xf32> to vector<2x128xf32>
    %17 = arith.addf %14, %16 : vector<2x128xf32>
    %c0_16 = arith.constant 0 : index
    %c0_17 = arith.constant 0 : index
    %18 = vector.load %arg8[%c0_16, %c0_17] : memref<2x128xf32, #tpu.memory_space<vmem>>, vector<2x128xf32>
    tpu.vector_store %arg8[%c0_16, %c0_17], %17 {strides = array<i32>} : memref<2x128xf32, #tpu.memory_space<vmem>>, vector<2x128xf32>,
    return
  }
  func.func @transform_0(%arg0: i32) -> (i32, i32) {
    %c0_i32 = arith.constant 0 : i32
    %c0_i32_0 = arith.constant 0 : i32
    return %arg0, %c0_i32 : i32, i32
  }
  func.func @transform_1(%arg0: i32) -> (i32, i32) {
    %c0_i32 = arith.constant 0 : i32
    %c0_i32_0 = arith.constant 0 : i32
    %c0_i32_1 = arith.constant 0 : i32
    return %c0_i32, %c0_i32_0 : i32, i32
  }
  func.func @transform_2(%arg0: i32) -> (i32, i32) {
    %c0_i32 = arith.constant 0 : i32
    %c0_i32_0 = arith.constant 0 : i32
    %c0_i32_1 = arith.constant 0 : i32
    return %c0_i32, %c0_i32_0 : i32, i32
  }
  func.func @transform_3(%arg0: i32) -> (i32, i32) {
    %c0_i32 = arith.constant 0 : i32
    %c0_i32_0 = arith.constant 0 : i32
    %c0_i32_1 = arith.constant 0 : i32
    return %c0_i32, %c0_i32_0 : i32, i32
  }
  func.func @transform_4(%arg0: i32) -> (i32, i32) {
    %c0_i32 = arith.constant 0 : i32
    %c0_i32_0 = arith.constant 0 : i32
    %c0_i32_1 = arith.constant 0 : i32
    return %c0_i32, %c0_i32_0 : i32, i32
  }
  func.func @transform_5(%arg0: i32) -> (i32, i32) {
    %c0_i32 = arith.constant 0 : i32
    %c0_i32_0 = arith.constant 0 : i32
    %c0_i32_1 = arith.constant 0 : i32
    return %c0_i32, %c0_i32_0 : i32, i32
  }
  func.func @transform_6(%arg0: i32) -> (i32, i32) {
    %c0_i32 = arith.constant 0 : i32
    %c0_i32_0 = arith.constant 0 : i32
    %c0_i32_1 = arith.constant 0 : i32
    return %c0_i32, %c0_i32_0 : i32, i32
  }
  func.func @transform_7(%arg0: i32) -> (i32, i32) {
    %c0_i32 = arith.constant 0 : i32
    %c0_i32_0 = arith.constant 0 : i32
    return %arg0, %c0_i32 : i32, i32
  }
}

</mosaic_0001>

<bundles_post_ra>
// kernel: masked_model_forward.1
= control target key start
LH: loop header
LB: loop body
LE: loop exit
PB: predicated region body
PF: predicated region fallthrough
CT: control target
= control target key end

     0   :  { %12 = vsyncpa [#allocation3], 0  ;;  %s471_s0 = inlined_call_operand.hbm [shape: f32[2,32], index: 0, kind: input, shape index: {}]   ;;  %s472_s1 = inlined_call_operand.hbm [shape: f32[32,128], index: 1, kind: input, shape index: {}]   ;;  %s473_s2 = inlined_call_operand.hbm [shape: f32[1,128], index: 2, kind: input, shape index: {}]   ;;  %s474_s3 = inlined_call_operand.hbm [shape: f32[128,128], index: 3, kind: input, shape index: {}]   ;;  %s475_s4 = inlined_call_operand.vmem [shape: f32[1,128], index: 4, kind: input, shape index: {}]   ;;  %s476_s5 = inlined_call_operand.hbm [shape: f32[128,128], index: 5, kind: input, shape index: {}]   ;;  %s477_s6 = inlined_call_operand.vmem [shape: f32[1,128], index: 6, kind: input, shape index: {}]   ;;  %s478_s7 = inlined_call_operand.hbm [shape: f32[2,128], index: 7, kind: output, shape index: {}]  }
   0x1   :  { %13 = vsyncpa [#allocation6], 0 }
   0x2   :  { %14 = vsyncpa [#allocation9], 0  ;;  %s31_s26 = sshll.u32 %s472_s1, 4  ;;  %s32_s26 = int_to_ptr.hbm [resolvable:$true] %s31_s26 }
   0x3   :  { %15 = vsyncpa [#allocation4], 0  ;;  %s399_s27 = smov [#allocation5]   ;;  %s55_s8 = sshll.u32 %s474_s3, 4  ;;  %s56_s8 = int_to_ptr.hbm [resolvable:$true] %s55_s8 }
   0x4   :  { %s33_s28 = sshll.u32 %s399_s27, 4  ;;  %s400_s9 = smov 128   ;;  %s34_s28 = int_to_ptr.vmem [resolvable:$true] %s33_s28 }
   0x5   :  { %s401_s10 = smov 8   ;;  %s402_s11 = smov [#allocation8]  }
   0x6   :  { %39 = dma.hbm_to_vmem [thread:$0]  %s32_s26, 512, %s34_s28, [#allocation6], %s400_s9, %s400_s9, %s401_s10  }
   0x7   :  { %s57_s12 = sshll.u32 %s402_s11, 4  ;;  %s21_s15 = sshll.u32 %s471_s0, 4  ;;  %s58_s12 = int_to_ptr.vmem [resolvable:$true] %s57_s12  ;;  %s22_s15 = int_to_ptr.hbm [resolvable:$true] %s21_s15 }
   0x8   :  { %63 = dma.hbm_to_vmem [thread:$0]  %s56_s8, 2048, %s58_s12, [#allocation9], %s400_s9, %s400_s9, %s401_s10  }
   0x9   :  { %s45_s17 = sshll.u32 %s473_s2, 4  ;;  %s403_s18 = smov [#allocation2]   ;;  %s46_s17 = int_to_ptr.hbm [resolvable:$true] %s45_s17 }
   0xa   :  { %s23_s19 = sshll.u32 %s403_s18, 4  ;;  %s404_s3 = smov [#allocation7]   ;;  %s24_s19 = int_to_ptr.vmem [resolvable:$true] %s23_s19 }
   0xb   :  { %26 = dma.hbm_to_vmem [thread:$0]  %s22_s15, 32, %s24_s19, [#allocation3]  }
   0xc   :  { %s47_s20 = sshll.u32 %s404_s3, 4  ;;  %s70_s23 = sshll.u32 %s476_s5, 4  ;;  %s48_s20 = int_to_ptr.vmem [resolvable:$true] %s47_s20  ;;  %s71_s23 = int_to_ptr.hbm [resolvable:$true] %s70_s23 }
   0xd   :  { %50 = dma.hbm_to_vmem [thread:$0]  %s46_s17, 16, %s48_s20, [#allocation6]  }
   0xe   :  { %s405_s0 = smov [#allocation10]  }
   0xf   :  { %s72_s24 = sshll.u32 %s405_s0, 4  ;;  %s73_s24 = int_to_ptr.vmem [resolvable:$true] %s72_s24 }
  0x10   :  { %78 = dma.hbm_to_vmem [thread:$0]  %s71_s23, 2048, %s73_s24, [#allocation9], %s400_s9, %s400_s9, %s401_s10  }
  0x11   :  { %391 = dma.done.wait [#allocation3], 32  }
  0x12   :  { %392 = vsyncadd [#allocation3], 4294967264 }
  0x13   :  { %393 = dma.done.wait [#allocation6], 528  }
  0x14   :  { %394 = vsyncadd [#allocation6], 4294966768 }
  0x15   :  { %395 = dma.done.wait [#allocation9], 4096  }
  0x16   :  { %396 = vsyncadd [#allocation9], 4294963200  ;;  %v105_v0 = vld [vmem:[#allocation5 + $0x18] sm:$0xff]  ;;  %v104_v1 = vld [vmem:[#allocation5 + $0x10] sm:$0xff]  ;;  %vm110_vm0 = vcmask 261120   ;;  %s406_s27 = smov [#allocation11]  }
  0x17   :  { %126 = vmatpush.msra.mxu0 %v105_v0  ;;  %v150_v2 = vld [vmem:[#allocation8 + $0x78] sm:$0xff]  ;;  %v103_v3 = vld [vmem:[#allocation5 + $0x8] sm:$0xff]  ;;  %v149_v4 = vld [vmem:[#allocation8 + $0x70] sm:$0xff]  ;;  %s221_s28 = sshll.u32 %s406_s27, 4  ;;  %s223_s8 = sshll.u32 %s478_s7, 4  ;;  %s222_s28 = int_to_ptr.vmem [resolvable:$true] %s221_s28  ;;  %s224_s8 = int_to_ptr.hbm [resolvable:$true] %s223_s8 }
  0x18   :  { %155 = vmatpush.msra.mxu1 %v150_v2  ;;  %v148_v5 = vld [vmem:[#allocation8 + $0x68] sm:$0xff]  ;;  %v102_v6 = vld [vmem:[#allocation5] sm:$0xff]  ;;  %v101_v7 = vld [vmem:[#allocation2] sm:$0x3] }
  0x19   :  { %127 = vmatpush.msra.mxu0 %v104_v1  ;;  %v147_v8 = vld [vmem:[#allocation8 + $0x60] sm:$0xff]  ;;  %v146_v9 = vld [vmem:[#allocation8 + $0x58] sm:$0xff]  ;;  %v145_v10 = vld [vmem:[#allocation8 + $0x50] sm:$0xff] }
  0x1a   :  { %156 = vmatpush.msra.mxu1 %v149_v4  ;;  %v144_v11 = vld [vmem:[#allocation8 + $0x48] sm:$0xff]  ;;  %v143_v12 = vld [vmem:[#allocation8 + $0x40] sm:$0xff]  ;;  %v142_v13 = vld [vmem:[#allocation8 + $0x38] sm:$0xff] }
  0x1b   :  { %128 = vmatpush.msra.mxu0 %v103_v3  ;;  %v141_v14 = vld [vmem:[#allocation8 + $0x30] sm:$0xff]  ;;  %v140_v15 = vld [vmem:[#allocation8 + $0x28] sm:$0xff]  ;;  %v139_v16 = vld [vmem:[#allocation8 + $0x20] sm:$0xff] }
  0x1c   :  { %157 = vmatpush.msra.mxu1 %v148_v5  ;;  %v138_v17 = vld [vmem:[#allocation8 + $0x18] sm:$0xff]  ;;  %v137_v18 = vld [vmem:[#allocation8 + $0x10] sm:$0xff]  ;;  %v136_v19 = vld [vmem:[#allocation8 + $0x8] sm:$0xff] }
  0x1d   :  { %129 = vmatpush.msra.mxu0 %v102_v6  ;;  %v135_v20 = vld [vmem:[#allocation8] sm:$0xff]  ;;  %v190_v21 = vld [vmem:[#allocation10 + $0x78] sm:$0xff]  ;;  %v189_v22 = vld [vmem:[#allocation10 + $0x70] sm:$0xff] }
  0x1e   :  { %235 = vmatmul.msk.f32.vlgmr.msra.gmra.mxu0 %vm110_vm0, %v101_v7  ;;  %158 = vmatpush.msra.mxu1 %v147_v8  ;;  %v188_v23 = vld [vmem:[#allocation10 + $0x68] sm:$0xff]  ;;  %v187_v24 = vld [vmem:[#allocation10 + $0x60] sm:$0xff]  ;;  %v186_v25 = vld [vmem:[#allocation10 + $0x58] sm:$0xff] }
  0x1f   :  { %195 = vmatpush.msra.mxu2 %v190_v21  ;;  %v185_v26 = vld [vmem:[#allocation10 + $0x50] sm:$0xff]  ;;  %v184_v27 = vld [vmem:[#allocation10 + $0x48] sm:$0xff]  ;;  %v183_v28 = vld [vmem:[#allocation10 + $0x40] sm:$0xff] }
  0x20   :  { %159 = vmatpush.msra.mxu1 %v146_v9  ;;  %v182_v29 = vld [vmem:[#allocation10 + $0x38] sm:$0xff]  ;;  %v181_v30 = vld [vmem:[#allocation10 + $0x30] sm:$0xff]  ;;  %v180_v31 = vld [vmem:[#allocation10 + $0x28] sm:$0xff] }
  0x21   :  { %196 = vmatpush.msra.mxu2 %v189_v22  ;;  %v179_v32 = vld [vmem:[#allocation10 + $0x20] sm:$0xff]  ;;  %v178_v33 = vld [vmem:[#allocation10 + $0x18] sm:$0xff]  ;;  %v177_v35 = vld [vmem:[#allocation10 + $0x10] sm:$0xff] }
  0x22   :  { %160 = vmatpush.msra.mxu1 %v145_v10  ;;  %v244_v34 = vld [vmem:[#allocation7] ss:$0 sm:$0xff]  ;;  %v176_v39 = vld [vmem:[#allocation10 + $0x8] sm:$0xff]  ;;  %v175_v40 = vld [vmem:[#allocation10] sm:$0xff] }
  0x23   :  { %197 = vmatpush.msra.mxu2 %v188_v23  ;;  %v245_v41 = vld [vmem:[%s475_s4] ss:$0 sm:$0xff] }
  0x24   :  { %161 = vmatpush.msra.mxu1 %v144_v11  ;;  %v246_v44 = vld [vmem:[%s477_s6] ss:$0 sm:$0xff] }
  0x25   :  { %198 = vmatpush.msra.mxu2 %v187_v24 }
  0x26   :  { %162 = vmatpush.msra.mxu1 %v143_v12 }
  0x27   :  { %199 = vmatpush.msra.mxu2 %v186_v25 }
  0x28   :  { %163 = vmatpush.msra.mxu1 %v142_v13 }
  0x29   :  { %200 = vmatpush.msra.mxu2 %v185_v26 }
  0x2a   :  { %164 = vmatpush.msra.mxu1 %v141_v14 }
  0x2b   :  { %201 = vmatpush.msra.mxu2 %v184_v27 }
  0x2c   :  { %165 = vmatpush.msra.mxu1 %v140_v15 }
  0x2d   :  { %202 = vmatpush.msra.mxu2 %v183_v28 }
  0x2e   :  { %166 = vmatpush.msra.mxu1 %v139_v16 }
  0x2f   :  { %203 = vmatpush.msra.mxu2 %v182_v29 }
  0x30   :  { %167 = vmatpush.msra.mxu1 %v138_v17 }
  0x31   :  { %204 = vmatpush.msra.mxu2 %v181_v30 }
  0x32   :  { %168 = vmatpush.msra.mxu1 %v137_v18 }
  0x33   :  { %205 = vmatpush.msra.mxu2 %v180_v31 }
  0x34   :  { %169 = vmatpush.msra.mxu1 %v136_v19 }
  0x35   :  { %206 = vmatpush.msra.mxu2 %v179_v32 }
  0x36   :  { %170 = vmatpush.msra.mxu1 %v135_v20 }
  0x37   :  { %207 = vmatpush.msra.mxu2 %v178_v33 }
  0x39   :  { %208 = vmatpush.msra.mxu2 %v177_v35 }
  0x3b   :  { %209 = vmatpush.msra.mxu2 %v176_v39 }
  0x3d   :  { %210 = vmatpush.msra.mxu2 %v175_v40 }
  0x9b   :  { %v131_v36 = vpop.f32.mrf.mxu0 }
  0x9c   :  { %v132_v37 = vadd.f32 %v244_v34, %v131_v36 }
  0x9e   :  { %v134_v38 = vmax.f32 %v132_v37, 0.0 }
  0xa0   :  { %171 = vmatmul.f32.vlgmr.msra.gmra.mxu1 %v134_v38 }
 0x11d   :  { %v172_v42 = vpop.f32.mrf.mxu1 }
 0x11e   :  { %v173_v43 = vadd.f32 %v245_v41, %v172_v42 }
 0x120   :  { %211 = vmatmul.f32.vlgmr.msra.gmra.mxu2 %v173_v43 }
 0x1a3   :  { %v212_v45 = vpop.f32.mrf.mxu2 }
 0x1a4   :  { %v213_v46 = vadd.f32 %v246_v44, %v212_v45 }
 0x1a6   :  { %215 = vst [vmem:[#allocation11] sm:$0x3] %v213_v46 }
 0x1a7   :  { %226 = dma.vmem_to_hbm [thread:$0]  %s222_s28, 32, %s224_s8, [#allocation4]  }
 0x1a8   :  { %397 = dma.done.wait [#allocation4], 32  }
 0x1a9   :  { %398 = vsyncadd [#allocation4], 4294967264 }
 0x1aa   :  { %231 = vsyncpa [#allocation3], 1 }
 0x1ab   :  { %232 = vsyncpa [#allocation6], 1 }
 0x1ac   :  { %233 = vsyncpa [#allocation9], 1 }
 0x1ad   :  { %234 = vsyncpa [#allocation4], 1 }

</bundles_post_ra>
